<compile_context>
chip_gen: v6e
topology: v6e:2x2x1
jax: 0.10.0
libtpu: 0.0.40
codegen_flags: <defaults>
</compile_context>

<pallas_src>
import functools
import math

import jax
import jax.numpy as jnp
from jax.experimental import pallas as pl
from jax.experimental.pallas import tpu as pltpu


# ----------------------------- PE buffer (init-time) -------------------------
def positional_encoding_table(maxlen: int, d_model: int) -> jnp.ndarray:
    """(maxlen, d_model) sin/cos table, identical to the PyTorch register_buffer."""
    den = jnp.exp(
        -jnp.arange(0, d_model, 2, dtype=jnp.float32) * (math.log(10000.0) / d_model)
    )
    pos = jnp.arange(maxlen, dtype=jnp.float32)[:, None]
    pe = jnp.zeros((maxlen, d_model), jnp.float32)
    pe = pe.at[:, 0::2].set(jnp.sin(pos * den))
    pe = pe.at[:, 1::2].set(jnp.cos(pos * den))
    return pe


# --------------------------------- kernels -----------------------------------
def _pe_add_kernel_2d(tok_ref, pe_ref, o_ref, *, rows, batch, pe_resident):
    # tok/o: (rows, B*D) lane-dense view.  pe: (Lpad, D) resident slab, or a
    # (rows, D) per-step slab when the table is too big to keep resident.
    if pe_resident:
        start = pl.multiple_of(pl.program_id(0) * rows, 8)
        pe_blk = pe_ref[pl.ds(start, rows), :]                      # (rows, D)
    else:
        pe_blk = pe_ref[...]                                        # (rows, D)
    if batch > 1:
        # Replicate the PE row across the batch lanes in-register; D is a
        # multiple of 128 on this path, so this is an aligned lane concat.
        pe_blk = jnp.concatenate([pe_blk] * batch, axis=-1)          # (rows, B*D)
    o_ref[...] = (tok_ref[...] + pe_blk).astype(o_ref.dtype)


def _pe_add_kernel_3d(tok_ref, pe_ref, o_ref, *, rows, pe_resident):
    # tok/o: (rows, B, D).  pe: (Lpad, 1, D) resident, or (rows, 1, D) per-step.
    if pe_resident:
        start = pl.multiple_of(pl.program_id(0) * rows, 8)
        pe_blk = pe_ref[pl.ds(start, rows), :, :]                    # (rows, 1, D)
    else:
        pe_blk = pe_ref[...]
    # Broadcast over the batch axis in-register — never materialized in HBM.
    o_ref[...] = (tok_ref[...] + pe_blk).astype(o_ref.dtype)


# --------------------------------- wrapper -----------------------------------
_TARGET_BLOCK_BYTES = 2 * 1024 * 1024     # ~2 MiB blocks: >=85%-roofline regime
_PE_RESIDENT_MAX_BYTES = 4 * 1024 * 1024  # keep PE resident only if it is small
_VMEM_LIMIT_BYTES = 32 * 1024 * 1024      # safe on v5e/v6e/v7x


def add_positional_encoding(token_embedding, pe_table, *, max_rows_per_block=None):
    """token_embedding: (L, B, D); pe_table: (maxlen, D) -> (L, B, D).

    Dropout is identity (eval / inference semantics).
    """
    L, B, D = token_embedding.shape
    assert pe_table.shape[0] >= L and pe_table.shape[1] == D

    out_dtype = jnp.result_type(token_embedding.dtype, pe_table.dtype)

    # --- auto-size the seq tile (rows per block) ---
    itemsize = jnp.dtype(token_embedding.dtype).itemsize
    row_bytes = max(B * D * itemsize, 1)
    rows = max(8, (_TARGET_BLOCK_BYTES // row_bytes) // 8 * 8)
    if max_rows_per_block is not None:
        rows = min(rows, max(8, (max_rows_per_block // 8) * 8))
    if rows >= L:
        rows, num_blocks = L, 1            # tiny tensor: single whole-array block
    else:
        num_blocks = int(pl.cdiv(L, rows))  # partial trailing block is masked by Pallas
    l_pad = num_blocks * rows

    # --- PE slab padded to the grid extent (values in the pad region are never
    # written to the output; the trailing partial block is clipped). ---
    if pe_table.shape[0] >= l_pad:
        pe = pe_table[:l_pad]
    else:
        pe = jnp.concatenate(
            [pe_table[:L], jnp.zeros((l_pad - L, D), pe_table.dtype)], axis=0
        )
    pe_resident = int(pe.size) * jnp.dtype(pe.dtype).itemsize <= _PE_RESIDENT_MAX_BYTES

    grid = (num_blocks,)
    compiler_params = pltpu.CompilerParams(
        dimension_semantics=("parallel",),   # v7x megacore shards the seq axis
        vmem_limit_bytes=_VMEM_LIMIT_BYTES,
    )

    lane_dense = (D % 128 == 0)
    if lane_dense:
        # 2-D lane-dense view: sublanes carry seq rows, lanes carry B*D.
        tok2d = token_embedding.reshape(L, B * D)
        if pe_resident:
            pe_spec = pl.BlockSpec((l_pad, D), lambda i: (0, 0))     # fetched once
        else:
            pe_spec = pl.BlockSpec((rows, D), lambda i: (i, 0))      # small per-step slab
        kernel = functools.partial(
            _pe_add_kernel_2d, rows=rows, batch=B, pe_resident=pe_resident
        )
        out2d = pl.pallas_call(
            kernel,
            out_shape=jax.ShapeDtypeStruct((L, B * D), out_dtype),
            grid=grid,
            in_specs=[
                pl.BlockSpec((rows, B * D), lambda i: (i, 0)),
                pe_spec,
            ],
            out_specs=pl.BlockSpec((rows, B * D), lambda i: (i, 0)),
            compiler_params=compiler_params,
        )(tok2d, pe)
        return out2d.reshape(L, B, D)

    # Fallback 3-D path (D not lane-aligned, e.g. tiny demo dims).
    pe3 = pe.reshape(l_pad, 1, D)
    if pe_resident:
        pe_spec = pl.BlockSpec((l_pad, 1, D), lambda i: (0, 0, 0))
    else:
        pe_spec = pl.BlockSpec((rows, 1, D), lambda i: (i, 0, 0))
    kernel = functools.partial(_pe_add_kernel_3d, rows=rows, pe_resident=pe_resident)
    return pl.pallas_call(
        kernel,
        out_shape=jax.ShapeDtypeStruct((L, B, D), out_dtype),
        grid=grid,
        in_specs=[
            pl.BlockSpec((rows, B, D), lambda i: (i, 0, 0)),
            pe_spec,
        ],
        out_specs=pl.BlockSpec((rows, B, D), lambda i: (i, 0, 0)),
        compiler_params=compiler_params,
    )(token_embedding, pe3)


# ----------------------------------- main ------------------------------------
if __name__ == "__main__":
    key = jax.random.PRNGKey(0)
    k1, k2, k3 = jax.random.split(key, 3)

    # --- 1) tiny case matching the module's typical toy use (seq=8, batch=2, d=32)
    #        (for shapes this small the launch dominates; in a real model this add
    #        would be fused into the neighboring op instead of its own kernel) ---
    SEQ, BATCH, D_MODEL, MAXLEN = 8, 2, 32, 64
    tok = jax.random.normal(k1, (SEQ, BATCH, D_MODEL), jnp.float32)
    pe = positional_encoding_table(MAXLEN, D_MODEL)
    out = jax.block_until_ready(add_positional_encoding(tok, pe))
    ref = tok + pe[:SEQ][:, None, :]
    assert out.shape == (SEQ, BATCH, D_MODEL), out.shape
    assert bool(jnp.all(jnp.isfinite(out)))
    assert bool(jnp.allclose(out, ref, atol=1e-6, rtol=1e-6))

    # --- 2) lane-dense (D % 128 == 0) tiled path with multiple grid steps ---
    SEQ2, BATCH2, D2, MAXLEN2 = 256, 4, 128, 512
    tok2 = jax.random.normal(k2, (SEQ2, BATCH2, D2), jnp.float32)
    pe2 = positional_encoding_table(MAXLEN2, D2)
    out2 = jax.block_until_ready(
        add_positional_encoding(tok2, pe2, max_rows_per_block=64)
    )
    ref2 = tok2 + pe2[:SEQ2][:, None, :]
    assert out2.shape == (SEQ2, BATCH2, D2), out2.shape
    assert bool(jnp.allclose(out2, ref2, atol=1e-6, rtol=1e-6))

    # --- 3) non-divisible seq length -> partial trailing block + PE zero-pad ---
    SEQ3, BATCH3, D3, MAXLEN3 = 200, 2, 128, 200
    tok3 = jax.random.normal(k3, (SEQ3, BATCH3, D3), jnp.float32)
    pe3 = positional_encoding_table(MAXLEN3, D3)
    out3 = jax.block_until_ready(
        add_positional_encoding(tok3, pe3, max_rows_per_block=64)
    )
    ref3 = tok3 + pe3[:SEQ3][:, None, :]
    assert out3.shape == (SEQ3, BATCH3, D3), out3.shape
    assert bool(jnp.allclose(out3, ref3, atol=1e-6, rtol=1e-6))

    print("KERNEL_OK")
</pallas_src>

<mosaic_0001>
module attributes {stable_mosaic.version = 11 : i64} {
  func.func @_pe_add_kernel_3d(%arg0: i32, %arg1: memref<8x2x32xf32, #tpu.memory_space<vmem>>, %arg2: memref<8x1x32xf32, #tpu.memory_space<vmem>>, %arg3: memref<8x2x32xf32, #tpu.memory_space<vmem>>) attributes {dimension_semantics = [#tpu.dimension_semantics<parallel>], iteration_bounds = array<i64: 1>, scalar_prefetch = 0 : i64, scratch_operands = 0 : i64, tpu.core_type = #tpu.core_type<tc>, window_params = [{transform_indices = @transform_0, window_bounds = array<i64: 8, 2, 32>}, {pipeline_mode = #tpu.pipeline_mode<synchronous>, transform_indices = @transform_1, window_bounds = array<i64: 8, 1, 32>}, {transform_indices = @transform_2, window_bounds = array<i64: 8, 2, 32>}]} {
    %c8_i32 = arith.constant 8 : i32
    %0 = arith.muli %arg0, %c8_i32 : i32
    %1 = tpu.assume_multiple %0, 8 : i32
    %2 = arith.index_cast %1 : i32 to index
    %c0 = arith.constant 0 : index
    %c0_0 = arith.constant 0 : index
    %3 = vector.load %arg2[%2, %c0, %c0_0] : memref<8x1x32xf32, #tpu.memory_space<vmem>>, vector<8x1x32xf32>
    %c0_1 = arith.constant 0 : index
    %c0_2 = arith.constant 0 : index
    %c0_3 = arith.constant 0 : index
    %4 = vector.load %arg1[%c0_1, %c0_2, %c0_3] : memref<8x2x32xf32, #tpu.memory_space<vmem>>, vector<8x2x32xf32>
    %5 = vector.broadcast %3 : vector<8x1x32xf32> to vector<8x2x32xf32>
    %6 = arith.addf %4, %5 : vector<8x2x32xf32>
    %c0_4 = arith.constant 0 : index
    %c0_5 = arith.constant 0 : index
    %c0_6 = arith.constant 0 : index
    %7 = vector.load %arg3[%c0_4, %c0_5, %c0_6] : memref<8x2x32xf32, #tpu.memory_space<vmem>>, vector<8x2x32xf32>
    tpu.vector_store %arg3[%c0_4, %c0_5, %c0_6], %6 {strides = array<i32>} : memref<8x2x32xf32, #tpu.memory_space<vmem>>, vector<8x2x32xf32>,
    return
  }
  func.func @transform_0(%arg0: i32) -> (i32, i32, i32) {
    %c0_i32 = arith.constant 0 : i32
    %c0_i32_0 = arith.constant 0 : i32
    %c0_i32_1 = arith.constant 0 : i32
    return %arg0, %c0_i32, %c0_i32_0 : i32, i32, i32
  }
  func.func @transform_1(%arg0: i32) -> (i32, i32, i32) {
    %c0_i32 = arith.constant 0 : i32
    %c0_i32_0 = arith.constant 0 : i32
    %c0_i32_1 = arith.constant 0 : i32
    %c0_i32_2 = arith.constant 0 : i32
    return %c0_i32, %c0_i32_0, %c0_i32_1 : i32, i32, i32
  }
  func.func @transform_2(%arg0: i32) -> (i32, i32, i32) {
    %c0_i32 = arith.constant 0 : i32
    %c0_i32_0 = arith.constant 0 : i32
    %c0_i32_1 = arith.constant 0 : i32
    return %arg0, %c0_i32, %c0_i32_0 : i32, i32, i32
  }
}

</mosaic_0001>

<bundles_post_ra>
// kernel: tpu_custom_call.1
= control target key start
LH: loop header
LB: loop body
LE: loop exit
PB: predicated region body
PF: predicated region fallthrough
CT: control target
= control target key end

     0   :  { %7 = vsyncpa [#allocation3], 0  ;;  %s270_s0 = inlined_call_operand.hbm [shape: f32[8,2,32], index: 0, kind: input, shape index: {}]   ;;  %s271_s1 = inlined_call_operand.hbm [shape: f32[8,1,32], index: 1, kind: input, shape index: {}]   ;;  %s272_s2 = inlined_call_operand.hbm [shape: f32[8,2,32], index: 2, kind: output, shape index: {}]  }
   0x1   :  { %8 = vsyncpa [#allocation6], 0 }
   0x2   :  { %9 = vsyncpa [#allocation4], 0  ;;  %s222_s9 = smov [#allocation2]  }
   0x3   :  { %s15_s10 = sshll.u32 %s222_s9, 4  ;;  %s16_s10 = int_to_ptr.vmem [resolvable:$true] %s15_s10 }
   0x4   :  { %s164_s11 = scalar_lea.vmem %s16_s10, 256  ;;  %p169_p1 = scmp.lt.s32.totalorder %s16_s10, %s16_s10 }
   0x5   :  { %p165_p0 = scmp.ne.s32.totalorder %s16_s10, %s164_s11  ;;  %p170_p2 = scmp.lt.s32.totalorder %s164_s11, %s164_s11 }
   0x7   :  { %p171_p3 = por %p170_p2, %p169_p1 }
   0x9   :  { %p172_p4 = pnand %p171_p3, %p165_p0 }
   0xb   :  { %175 = shalt.err (!%p172_p4)
}
   0xc   :  { %s223_s12 = smov 32   ;;  %s224_s13 = smov 2  }
   0xd   :  { %21 = dma.hbm_to_vmem [thread:$0]  %s270_s0, 256, %s16_s10, [#allocation3], %s223_s12, %s223_s12, %s224_s13  }
   0xe   :  { %s225_s16 = smov [#allocation5]  }
   0xf   :  { %s27_s17 = sshll.u32 %s225_s16, 4  ;;  %s28_s17 = int_to_ptr.vmem [resolvable:$true] %s27_s17 }
  0x10   :  { %s184_s18 = scalar_lea.vmem %s28_s17, 128  ;;  %p189_p6 = scmp.lt.s32.totalorder %s28_s17, %s28_s17 }
  0x11   :  { %p185_p5 = scmp.ne.s32.totalorder %s28_s17, %s184_s18  ;;  %p190_p7 = scmp.lt.s32.totalorder %s184_s18, %s184_s18 }
  0x13   :  { %p191_p8 = por %p190_p7, %p189_p6 }
  0x15   :  { %p192_p9 = pnand %p191_p8, %p185_p5 }
  0x17   :  { %195 = shalt.err (!%p192_p9)
}
  0x18   :  { %s226_s19 = smov 16   ;;  %s227_s20 = smov 1  }
  0x19   :  { %33 = dma.hbm_to_vmem [thread:$0]  %s271_s1, 128, %s28_s17, [#allocation6], %s226_s19, %s226_s19, %s227_s20  }
  0x1a   :  { %216 = dma.done.wait [#allocation3], 256  }
  0x1b   :  { %217 = vsyncadd [#allocation3], 4294967040 }
  0x1c   :  { %218 = dma.done.wait [#allocation6], 128  }
  0x1d   :  { %219 = vsyncadd [#allocation6], 4294967168  ;;  %vm114_vm0 = vcmask 254976   ;;  %s228_s0 = smov [#allocation7]   ;;  %v141_v0 = vld [vmem:[#allocation5] ss:$0 sm:$0xff] }
  0x1e   :  { %s253_s23 = sshll.u32 %s228_s0, 4  ;;  %v50_v1 = vld [vmem:[#allocation2] sm:$0x3]  ;;  %v142_v2 = vld [vmem:[#allocation5 + $0x1] ss:$0 sm:$0xff]  ;;  %s129_s23 = int_to_ptr.vmem [resolvable:$true] %s253_s23 }
  0x1f   :  { %v106_v3 = vadd.f32 %v141_v0, %v50_v1  ;;  %v51_v4 = vld [vmem:[#allocation2 + $0x2] sm:$0x3]  ;;  %v143_v5 = vld [vmem:[#allocation5 + $0x2] ss:$0 sm:$0xff]  ;;  %v52_v6 = vld [vmem:[#allocation2 + $0x4] sm:$0x3]  ;;  %p201_p11 = scmp.lt.s32.totalorder %s129_s23, %s129_s23 }
  0x20   :  { %v107_v7 = vadd.f32 %v142_v2, %v51_v4  ;;  %v108_v8 = vadd.f32 %v143_v5, %v52_v6  ;;  %v144_v9 = vld [vmem:[#allocation5 + $0x3] ss:$0 sm:$0xff]  ;;  %v53_v10 = vld [vmem:[#allocation2 + $0x6] sm:$0x3]  ;;  %v145_v11 = vld [vmem:[#allocation5 + $0x4] ss:$0 sm:$0xff] }
  0x21   :  { %115 = vst.msk [vmem:[#allocation7] sm:$0x3] %vm114_vm0, %v106_v3  ;;  %v109_v12 = vadd.f32 %v144_v9, %v53_v10  ;;  %v54_v13 = vld [vmem:[#allocation2 + $0x8] sm:$0x3]  ;;  %v146_v14 = vld [vmem:[#allocation5 + $0x5] ss:$0 sm:$0xff] }
  0x22   :  { %v55_v15 = vld [vmem:[#allocation2 + $0xa] sm:$0x3]  ;;  %116 = vst.msk [vmem:[#allocation7 + $0x2] sm:$0x3] %vm114_vm0, %v107_v7  ;;  %117 = vst.msk [vmem:[#allocation7 + $0x4] sm:$0x3] %vm114_vm0, %v108_v8  ;;  %v110_v16 = vadd.f32 %v145_v11, %v54_v13 }
  0x23   :  { %v111_v17 = vadd.f32 %v146_v14, %v55_v15  ;;  %v147_v18 = vld [vmem:[#allocation5 + $0x6] ss:$0 sm:$0xff]  ;;  %v56_v19 = vld [vmem:[#allocation2 + $0xc] sm:$0x3]  ;;  %v148_v20 = vld [vmem:[#allocation5 + $0x7] ss:$0 sm:$0xff] }
  0x24   :  { %118 = vst.msk [vmem:[#allocation7 + $0x6] sm:$0x3] %vm114_vm0, %v109_v12  ;;  %v112_v21 = vadd.f32 %v147_v18, %v56_v19  ;;  %v57_v22 = vld [vmem:[#allocation2 + $0xe] sm:$0x3]  ;;  %119 = vst.msk [vmem:[#allocation7 + $0x8] sm:$0x3] %vm114_vm0, %v110_v16 }
  0x25   :  { %120 = vst.msk [vmem:[#allocation7 + $0xa] sm:$0x3] %vm114_vm0, %v111_v17  ;;  %v113_v23 = vadd.f32 %v148_v20, %v57_v22  ;;  %s196_s1 = scalar_lea.vmem %s129_s23, 256 }
  0x26   :  { %121 = vst.msk [vmem:[#allocation7 + $0xc] sm:$0x3] %vm114_vm0, %v112_v21  ;;  %p197_p10 = scmp.ne.s32.totalorder %s129_s23, %s196_s1  ;;  %p202_p12 = scmp.lt.s32.totalorder %s196_s1, %s196_s1 }
  0x27   :  { %122 = vst.msk [vmem:[#allocation7 + $0xe] sm:$0x3] %vm114_vm0, %v113_v23 }
  0x28   :  { %p203_p13 = por %p202_p12, %p201_p11 }
  0x2a   :  { %p204_p0 = pnand %p203_p13, %p197_p10 }
  0x2c   :  { %207 = shalt.err (!%p204_p0)
}
  0x2d   :  { %134 = dma.vmem_to_hbm [thread:$0]  %s129_s23, 256, %s272_s2, [#allocation4], %s223_s12, %s223_s12, %s224_s13  }
  0x2e   :  { %220 = dma.done.wait [#allocation4], 256  }
  0x2f   :  { %221 = vsyncadd [#allocation4], 4294967040 }
  0x30   :  { %138 = vsyncpa [#allocation3], 1 }
  0x31   :  { %139 = vsyncpa [#allocation6], 1 }
  0x32   :  { %140 = vsyncpa [#allocation4], 1 }

</bundles_post_ra>
